<compile_context>
chip_gen: v5e
topology: v5e:2x2
jax: 0.10.0
libtpu: 0.0.40
codegen_flags: <defaults>
</compile_context>

<pallas_src>
from typing import NamedTuple

import jax
import jax.numpy as jnp
from jax.experimental import pallas as pl
from jax.experimental.pallas import tpu as pltpu


def _round_up(x: int, m: int) -> int:
    return ((x + m - 1) // m) * m


class LinearParams(NamedTuple):
    """One-time prepared nn.Linear parameters (weight-stationary layout)."""
    w_kn: jax.Array   # (K_pad, N_pad)  pre-transposed, pre-padded, f32 or bf16
    b_1n: jax.Array   # (1, N_pad)      f32
    n: int            # logical N (output features)
    k: int            # logical K (input features)
    tn: int           # N tile used for padding
    tk: int           # K tile used for padding


def linear_kernel(x_ref, w_ref, b_ref, o_ref):
    # x_ref: (tm, tk), w_ref: (tk, tn), b_ref: (1, tn), o_ref: (tm, tn) f32.
    # o_ref's BlockSpec ignores k, so the output block stays resident in VMEM
    # across the whole K axis -> accumulate directly into it (f32 output only).
    k = pl.program_id(2)

    @pl.when(k == 0)
    def _():
        o_ref[...] = jnp.zeros_like(o_ref)

    xv = x_ref[...]
    wv = w_ref[...]
    if xv.dtype != wv.dtype:
        # bf16-operand MXU path: w was pre-cast in prepare_linear_params,
        # cast the x tile here (cheap VPU cast on VMEM-resident data).
        xv = xv.astype(wv.dtype)

    o_ref[...] += jnp.dot(xv, wv, preferred_element_type=jnp.float32)

    @pl.when(k == pl.num_programs(2) - 1)
    def _():
        # Bias added exactly once, on the last K step, in f32.
        o_ref[...] += b_ref[...]


def prepare_linear_params(weight, bias, *, tn=512, tk=512,
                          operand_dtype=jnp.float32) -> LinearParams:
    """One-time parameter prep (hoisted out of the per-call hot path).

    weight: (N, K) PyTorch nn.Linear layout -> stored as (K, N) for the MXU.
    bias:   (N,)                            -> stored as (1, N), f32.
    Padding of K/N to the tile grid and the optional bf16 operand cast are
    done here, once, so the per-call path never re-pads or re-casts weights.
    """
    weight = jnp.asarray(weight)
    bias = jnp.asarray(bias)
    n_out, k_in = weight.shape

    # Clamp tiles for small problems; keep lane (128) alignment.
    tk = min(tk, _round_up(k_in, 128))
    tn = min(tn, _round_up(n_out, 128))
    k_pad = _round_up(k_in, tk)
    n_pad = _round_up(n_out, tn)

    w_kn = weight.T  # (K, N)
    if (k_pad, n_pad) != (k_in, n_out):
        w_kn = jnp.pad(w_kn, ((0, k_pad - k_in), (0, n_pad - n_out)))
    w_kn = w_kn.astype(operand_dtype)

    b_1n = bias.reshape(1, -1).astype(jnp.float32)
    if n_pad != n_out:
        b_1n = jnp.pad(b_1n, ((0, 0), (0, n_pad - n_out)))

    return LinearParams(w_kn=w_kn, b_1n=b_1n, n=n_out, k=k_in, tn=tn, tk=tk)


def linear_forward(x, params: LinearParams, *, tm=512):
    """y = x @ W^T + b.

    x: (M, K) float32, params from prepare_linear_params.  Returns (M, N) f32.
    Defaults (tm=tn=tk=512) are safe on v5e/v6e/v7x; on v5e/v6e with large N
    consider tn=1024 at prepare time for fewer x re-reads.
    """
    M, K = x.shape
    assert K == params.k, f"expected K={params.k}, got {K}"
    K_pad, N_pad = params.w_kn.shape
    tk, tn = params.tk, params.tn

    # Clamp the M tile; keep sublane (8) alignment.
    tm = min(tm, _round_up(M, 8))
    M_pad = _round_up(M, tm)

    # v7x megacore heuristic: if the M axis is a single block, make sure the
    # N axis has >= 2 blocks so both TensorCores get work.
    tn_eff = tn
    if M_pad // tm == 1 and N_pad // tn_eff == 1 and tn_eff % 256 == 0:
        tn_eff //= 2

    # Pad x only when needed (avoids a per-call HBM round trip in the common
    # case where M/K already divide the tiles).
    x_p = x
    if (M_pad, K_pad) != (M, K):
        x_p = jnp.pad(x, ((0, M_pad - M), (0, K_pad - K)))

    grid = (M_pad // tm, N_pad // tn_eff, K_pad // tk)

    # VMEM budget: double-buffered inputs + double-buffered f32 output block.
    x_item = x_p.dtype.itemsize
    w_item = params.w_kn.dtype.itemsize
    vmem_needed = (2 * (tm * tk * x_item + tk * tn_eff * w_item + tn_eff * 4)
                   + 2 * tm * tn_eff * 4)
    vmem_limit = int(min(64 << 20, max(32 << 20, vmem_needed + (8 << 20))))

    # Bytes as actually moved by the tiled schedule (x re-read per N block,
    # w re-read per M block).
    bytes_accessed = (M_pad * K_pad * x_item * (N_pad // tn_eff)
                      + K_pad * N_pad * w_item * (M_pad // tm)
                      + M_pad * N_pad * 4
                      + N_pad * 4)

    out = pl.pallas_call(
        linear_kernel,
        out_shape=jax.ShapeDtypeStruct((M_pad, N_pad), jnp.float32),
        grid_spec=pltpu.PrefetchScalarGridSpec(
            num_scalar_prefetch=0,
            grid=grid,
            in_specs=[
                pl.BlockSpec((tm, tk), lambda i, j, k: (i, k)),
                pl.BlockSpec((tk, tn_eff), lambda i, j, k: (k, j)),
                pl.BlockSpec((1, tn_eff), lambda i, j, k: (0, j)),
            ],
            out_specs=pl.BlockSpec((tm, tn_eff), lambda i, j, k: (i, j)),
        ),
        compiler_params=pltpu.CompilerParams(
            dimension_semantics=("parallel", "parallel", "arbitrary"),
            vmem_limit_bytes=vmem_limit,
        ),
        cost_estimate=pl.CostEstimate(
            flops=2 * M_pad * N_pad * K_pad,
            transcendentals=0,
            bytes_accessed=bytes_accessed,
        ),
    )(x_p, params.w_kn, params.b_1n)

    # Strip padding back off.
    return out[:M, :params.n]


if __name__ == "__main__":
    # Small shapes implied by the module: n_features in == out.
    batch = 8
    n_features = 32

    key = jax.random.PRNGKey(0)
    kx, kw, kb = jax.random.split(key, 3)

    x = jax.random.normal(kx, (batch, n_features), dtype=jnp.float32)
    # Deterministic "nn.Linear"-style parameter init (uniform in +/- 1/sqrt(K)).
    bound = 1.0 / jnp.sqrt(jnp.float32(n_features))
    weight = jax.random.uniform(
        kw, (n_features, n_features), dtype=jnp.float32, minval=-bound, maxval=bound
    )
    bias = jax.random.uniform(
        kb, (n_features,), dtype=jnp.float32, minval=-bound, maxval=bound
    )

    # Plain-JAX reference (PyTorch nn.Linear semantics).
    y_ref = x @ weight.T + bias

    # 1) Exact-numerics path: f32 operands, f32 accumulate.
    params_f32 = prepare_linear_params(weight, bias)
    y = linear_forward(x, params_f32)
    jax.block_until_ready(y)
    assert y.shape == (batch, n_features)
    assert jnp.allclose(y, y_ref, atol=1e-5, rtol=1e-5)

    # 2) High-throughput path: bf16 MXU operands, f32 accumulate
    #    (2-4x MXU throughput and half the x/w HBM bytes on v6e/v7x;
    #    numerics differ at ~1e-2 relative -- opt-in).
    params_bf16 = prepare_linear_params(weight, bias, operand_dtype=jnp.bfloat16)
    y_bf16 = linear_forward(x, params_bf16)
    jax.block_until_ready(y_bf16)
    assert jnp.allclose(y_bf16, y_ref, atol=3e-2, rtol=3e-2)

    print("KERNEL_OK")
</pallas_src>

<mosaic_0001>
module attributes {stable_mosaic.version = 11 : i64} {
  func.func @linear_kernel(%arg0: i32, %arg1: i32, %arg2: i32, %arg3: memref<8x128xf32, #tpu.memory_space<vmem>>, %arg4: memref<128x128xf32, #tpu.memory_space<vmem>>, %arg5: memref<1x128xf32, #tpu.memory_space<vmem>>, %arg6: memref<8x128xf32, #tpu.memory_space<vmem>>) attributes {dimension_semantics = [#tpu.dimension_semantics<parallel>, #tpu.dimension_semantics<parallel>, #tpu.dimension_semantics<arbitrary>], iteration_bounds = array<i64: 1, 1, 1>, scalar_prefetch = 0 : i64, scratch_operands = 0 : i64, tpu.core_type = #tpu.core_type<tc>, window_params = [{transform_indices = @transform_0, window_bounds = array<i64: 8, 128>}, {transform_indices = @transform_1, window_bounds = array<i64: 128, 128>}, {transform_indices = @transform_2, window_bounds = array<i64: 1, 128>}, {transform_indices = @transform_3, window_bounds = array<i64: 8, 128>}]} {
    %c0_i32 = arith.constant 0 : i32
    %0 = arith.cmpi eq, %arg2, %c0_i32 : i32
    %1 = arith.extui %0 : i1 to i32
    %c0_i32_0 = arith.constant 0 : i32
    %2 = arith.cmpi ne, %1, %c0_i32_0 : i32
    scf.if %2 {
      %cst_10 = arith.constant 0.000000e+00 : f32
      %12 = vector.broadcast %cst_10 : f32 to vector<8x128xf32>
      %c0_11 = arith.constant 0 : index
      %c0_12 = arith.constant 0 : index
      %13 = vector.load %arg6[%c0_11, %c0_12] : memref<8x128xf32, #tpu.memory_space<vmem>>, vector<8x128xf32>
      tpu.vector_store %arg6[%c0_11, %c0_12], %12 {strides = array<i32>} : memref<8x128xf32, #tpu.memory_space<vmem>>, vector<8x128xf32>,
    } else {
    }
    %c0 = arith.constant 0 : index
    %c0_1 = arith.constant 0 : index
    %3 = vector.load %arg3[%c0, %c0_1] : memref<8x128xf32, #tpu.memory_space<vmem>>, vector<8x128xf32>
    %c0_2 = arith.constant 0 : index
    %c0_3 = arith.constant 0 : index
    %4 = vector.load %arg4[%c0_2, %c0_3] : memref<128x128xf32, #tpu.memory_space<vmem>>, vector<128x128xf32>
    %c0_4 = arith.constant 0 : index
    %c0_5 = arith.constant 0 : index
    %5 = vector.load %arg6[%c0_4, %c0_5] : memref<8x128xf32, #tpu.memory_space<vmem>>, vector<8x128xf32>
    %cst = arith.constant dense<0.000000e+00> : vector<8x128xf32>
    %6 = tpu.matmul %3, %4, %cst {dimension_numbers = #tpu.dot_dimension_numbers<[1], [0], [0], [1], [0, 0, 1, 1], [], []>} : vector<8x128xf32>, vector<128x128xf32>, vector<8x128xf32> -> vector<8x128xf32>
    %7 = arith.addf %5, %6 : vector<8x128xf32>
    %c0_6 = arith.constant 0 : index
    %c0_7 = arith.constant 0 : index
    %8 = vector.load %arg6[%c0_6, %c0_7] : memref<8x128xf32, #tpu.memory_space<vmem>>, vector<8x128xf32>
    tpu.vector_store %arg6[%c0_6, %c0_7], %7 {strides = array<i32>} : memref<8x128xf32, #tpu.memory_space<vmem>>, vector<8x128xf32>,
    %c0_i32_8 = arith.constant 0 : i32
    %9 = arith.cmpi eq, %arg2, %c0_i32_8 : i32
    %10 = arith.extui %9 : i1 to i32
    %c0_i32_9 = arith.constant 0 : i32
    %11 = arith.cmpi ne, %10, %c0_i32_9 : i32
    scf.if %11 {
      %c0_10 = arith.constant 0 : index
      %c0_11 = arith.constant 0 : index
      %12 = vector.load %arg6[%c0_10, %c0_11] : memref<8x128xf32, #tpu.memory_space<vmem>>, vector<8x128xf32>
      %c0_12 = arith.constant 0 : index
      %c0_13 = arith.constant 0 : index
      %13 = vector.load %arg5[%c0_12, %c0_13] : memref<1x128xf32, #tpu.memory_space<vmem>>, vector<1x128xf32>
      %14 = vector.broadcast %13 : vector<1x128xf32> to vector<8x128xf32>
      %15 = arith.addf %12, %14 : vector<8x128xf32>
      %c0_14 = arith.constant 0 : index
      %c0_15 = arith.constant 0 : index
      %16 = vector.load %arg6[%c0_14, %c0_15] : memref<8x128xf32, #tpu.memory_space<vmem>>, vector<8x128xf32>
      tpu.vector_store %arg6[%c0_14, %c0_15], %15 {strides = array<i32>} : memref<8x128xf32, #tpu.memory_space<vmem>>, vector<8x128xf32>,
    } else {
    }
    return
  }
  func.func @transform_0(%arg0: i32, %arg1: i32, %arg2: i32) -> (i32, i32) {
    %c0_i32 = arith.constant 0 : i32
    return %arg0, %arg2 : i32, i32
  }
  func.func @transform_1(%arg0: i32, %arg1: i32, %arg2: i32) -> (i32, i32) {
    %c0_i32 = arith.constant 0 : i32
    return %arg2, %arg1 : i32, i32
  }
  func.func @transform_2(%arg0: i32, %arg1: i32, %arg2: i32) -> (i32, i32) {
    %c0_i32 = arith.constant 0 : i32
    %c0_i32_0 = arith.constant 0 : i32
    return %c0_i32, %arg1 : i32, i32
  }
  func.func @transform_3(%arg0: i32, %arg1: i32, %arg2: i32) -> (i32, i32) {
    %c0_i32 = arith.constant 0 : i32
    return %arg0, %arg1 : i32, i32
  }
}

</mosaic_0001>

<bundles_post_ra>
// kernel: tpu_custom_call.1
= control target key start
LH: loop header
LB: loop body
LE: loop exit
PB: predicated region body
PF: predicated region fallthrough
CT: control target
= control target key end

     0   :  { %8 = vsyncpa [#allocation3], 0  ;;  %s240_s0 = inlined_call_operand.hbm [shape: f32[8,128], index: 0, kind: input, shape index: {}]   ;;  %s241_s1 = inlined_call_operand.hbm [shape: f32[128,128], index: 1, kind: input, shape index: {}]   ;;  %s242_s2 = inlined_call_operand.vmem [shape: f32[1,128], index: 2, kind: input, shape index: {}]   ;;  %s243_s3 = inlined_call_operand.hbm [shape: f32[8,128], index: 3, kind: output, shape index: {}]  }
   0x1   :  { %9 = vsyncpa [#allocation6], 0 }
   0x2   :  { %10 = vsyncpa [#allocation4], 0  ;;  %s16_s14 = sshll.u32 %s240_s0, 4  ;;  %s203_s15 = smov [#allocation2]   ;;  %s17_s14 = int_to_ptr.hbm [resolvable:$true] %s16_s14 }
   0x3   :  { %s18_s16 = sshll.u32 %s203_s15, 4  ;;  %s26_s19 = sshll.u32 %s241_s1, 4  ;;  %s19_s16 = int_to_ptr.vmem [resolvable:$true] %s18_s16  ;;  %s27_s19 = int_to_ptr.hbm [resolvable:$true] %s26_s19 }
   0x4   :  { %21 = dma.hbm_to_vmem [thread:$0]  %s17_s14, 128, %s19_s16, [#allocation3]  }
   0x5   :  { %s204_s20 = smov [#allocation5]   ;;  %s205_s22 = smov 128  }
   0x6   :  { %s28_s21 = sshll.u32 %s204_s20, 4  ;;  %s206_s23 = smov 8   ;;  %s29_s21 = int_to_ptr.vmem [resolvable:$true] %s28_s21 }
   0x7   :  { %34 = dma.hbm_to_vmem [thread:$0]  %s27_s19, 2048, %s29_s21, [#allocation6], %s205_s22, %s205_s22, %s206_s23  }
   0x8   :  { %197 = dma.done.wait [#allocation3], 128  }
   0x9   :  { %198 = vsyncadd [#allocation3], 4294967168 }
   0xa   :  { %199 = dma.done.wait [#allocation6], 2048  }
   0xb   :  { %200 = vsyncadd [#allocation6], 4294965248  ;;  %v66_v0 = vld [vmem:[#allocation5 + $0x78] sm:$0xff]  ;;  %v65_v1 = vld [vmem:[#allocation5 + $0x70] sm:$0xff]  ;;  %s207_s24 = smov [#allocation7]   ;;  %s107_s28 = sshll.u32 %s243_s3, 4  ;;  %s108_s28 = int_to_ptr.hbm [resolvable:$true] %s107_s28 }
   0xc   :  { %68 = vmatpush.msra.mxu0 %v66_v0  ;;  %v64_v2 = vld [vmem:[#allocation5 + $0x68] sm:$0xff]  ;;  %v63_v3 = vld [vmem:[#allocation5 + $0x60] sm:$0xff]  ;;  %v62_v4 = vld [vmem:[#allocation5 + $0x58] sm:$0xff]  ;;  %s105_s25 = sshll.u32 %s207_s24, 4  ;;  %s106_s25 = int_to_ptr.vmem [resolvable:$true] %s105_s25 }
   0xd   :  { %v61_v5 = vld [vmem:[#allocation5 + $0x50] sm:$0xff]  ;;  %v60_v6 = vld [vmem:[#allocation5 + $0x48] sm:$0xff]  ;;  %v59_v7 = vld [vmem:[#allocation5 + $0x40] sm:$0xff] }
   0xe   :  { %69 = vmatpush.msra.mxu0 %v65_v1  ;;  %v58_v8 = vld [vmem:[#allocation5 + $0x38] sm:$0xff]  ;;  %v57_v9 = vld [vmem:[#allocation5 + $0x30] sm:$0xff]  ;;  %v56_v10 = vld [vmem:[#allocation5 + $0x28] sm:$0xff] }
   0xf   :  { %v55_v11 = vld [vmem:[#allocation5 + $0x20] sm:$0xff]  ;;  %v54_v12 = vld [vmem:[#allocation5 + $0x18] sm:$0xff]  ;;  %v53_v13 = vld [vmem:[#allocation5 + $0x10] sm:$0xff] }
  0x10   :  { %70 = vmatpush.msra.mxu0 %v64_v2  ;;  %v52_v14 = vld [vmem:[#allocation5 + $0x8] sm:$0xff]  ;;  %v51_v15 = vld [vmem:[#allocation5] sm:$0xff]  ;;  %v50_v16 = vld [vmem:[#allocation2] sm:$0xff] }
  0x11   :  { %v124_v17 = vld [vmem:[%s242_s2] ss:$0 sm:$0xff] }
  0x12   :  { %71 = vmatpush.msra.mxu0 %v63_v3 }
  0x14   :  { %72 = vmatpush.msra.mxu0 %v62_v4 }
  0x16   :  { %73 = vmatpush.msra.mxu0 %v61_v5 }
  0x18   :  { %74 = vmatpush.msra.mxu0 %v60_v6 }
  0x1a   :  { %75 = vmatpush.msra.mxu0 %v59_v7 }
  0x1c   :  { %76 = vmatpush.msra.mxu0 %v58_v8 }
  0x1e   :  { %77 = vmatpush.msra.mxu0 %v57_v9 }
  0x20   :  { %78 = vmatpush.msra.mxu0 %v56_v10 }
  0x22   :  { %79 = vmatpush.msra.mxu0 %v55_v11 }
  0x24   :  { %80 = vmatpush.msra.mxu0 %v54_v12 }
  0x26   :  { %81 = vmatpush.msra.mxu0 %v53_v13 }
  0x28   :  { %82 = vmatpush.msra.mxu0 %v52_v14 }
  0x2a   :  { %83 = vmatpush.msra.mxu0 %v51_v15 }
  0x2b   :  { %84 = vmatmul.f32.vlgmr.msra.gmra.mxu0 %v50_v16 }
  0xa8   :  { %v85_v18 = vpop.f32.mrf.mxu0 }
  0xa9   :  { %v98_v19 = vadd.f32 %v124_v17, %v85_v18 }
  0xab   :  { %99 = vst [vmem:[#allocation7] sm:$0xff] %v98_v19 }
  0xac   :  { %110 = dma.vmem_to_hbm [thread:$0]  %s106_s25, 128, %s108_s28, [#allocation4]  }
  0xad   :  { %201 = dma.done.wait [#allocation4], 128  }
  0xae   :  { %202 = vsyncadd [#allocation4], 4294967168 }
  0xaf   :  { %115 = vsyncpa [#allocation3], 1 }
  0xb0   :  { %116 = vsyncpa [#allocation6], 1 }
  0xb1   :  { %117 = vsyncpa [#allocation4], 1 }

</bundles_post_ra>
